<compile_context>
chip_gen: v6e
topology: v6e:2x2x1
jax: 0.10.0
libtpu: 0.0.40
codegen_flags: <defaults>
</compile_context>

<pallas_src>
import functools

import jax
import jax.numpy as jnp
import numpy as np
from jax import lax
from jax.experimental import pallas as pl
from jax.experimental.pallas import tpu as pltpu

_LANE = 128


def _round_up(x, m):
    return ((x + m - 1) // m) * m


def _sublane_multiple(itemsize):
    # Packed sublane tile: f32 -> 8, bf16/f16 -> 16, int8/fp8 -> 32.
    return 8 * max(1, 4 // int(itemsize))


def _vmem_capacity_bytes():
    try:
        info = pltpu.get_tpu_info()
        cap = int(getattr(info, "vmem_capacity_bytes", 0))
        if cap > 0:
            return cap
    except Exception:
        pass
    return 64 * 1024 * 1024  # conservative fallback (v7x-sized VMEM)


def _choose_tiles(R, L, sub, budget_itemsize):
    """Pick a lane-dense DMA block (TR, TL) and an in-kernel compute chunk
    (CH, CW) small enough for the elementwise chain to live in vregs."""
    cap = _vmem_capacity_bytes()
    # ~2 MiB / stream / step on 64 MiB parts (v7x), ~4 MiB on 128 MiB parts
    # (v5e/v6e).  2 streams x 2 pipeline buffers stays far below the cap.
    block_bytes = (4 if cap >= 100 * 1024 * 1024 else 2) * 1024 * 1024
    max_elems = max(sub * _LANE, block_bytes // int(budget_itemsize))

    if L <= 512:
        tl = _round_up(L, _LANE)
    else:
        # keep TL a multiple of 512 so the compute chunk width divides it
        tl = min(_round_up(L, 512), 2048)
    tr_cap = max(sub, (max_elems // tl) // sub * sub)
    tr = min(_round_up(R, sub), tr_cap)

    # compute chunk: ~4K f32 elements -> ~4 vregs per live intermediate
    ch = sub
    cw_target = max(_LANE, (4096 // ch) // _LANE * _LANE)
    if tl <= cw_target:
        cw = tl
    else:
        cw = _LANE
        c = cw_target
        while c >= _LANE:
            if tl % c == 0:
                cw = c
                break
            c -= _LANE
    return tr, tl, ch, cw, cap


def _int_pow(x, n):
    """x**n for non-negative integer n via repeated squaring (VPU only)."""
    if n == 0:
        return jnp.ones_like(x)
    result = None
    base = x
    while True:
        if n & 1:
            result = base if result is None else result * base
        n >>= 1
        if n == 0:
            break
        base = base * base
    return result


def _neg_weights(one_m_gt, gamma):
    g = gamma
    if isinstance(g, float) and float(g).is_integer():
        g = int(g)
    if isinstance(g, (int, np.integer)) and g >= 0:
        return _int_pow(one_m_gt, int(g))
    # Non-integer gamma: transcendental pow (matches the reference, including
    # its NaN behaviour if gt > 1 ever occurs).
    return jnp.power(one_m_gt, jnp.float32(g))


def _focal_kernel(*refs, gamma, true_r, true_l, has_weight,
                  tr, tl, ch, cw, gi, gj, mask_rows, mask_cols):
    if has_weight:
        pred_ref, gt_ref, w_ref, out_ref = refs
    else:
        pred_ref, gt_ref, out_ref = refs
        w_ref = None

    i = pl.program_id(0)  # row-block axis   ("parallel")
    j = pl.program_id(1)  # lane-block axis  ("parallel")
    nrc = tr // ch
    ncw = tl // cw
    nchunks = nrc * ncw

    def block_sums(masked):
        """Sum loss / pos-count over this block, chunk by chunk, with the
        partial sums carried in vregs (no full-block f32 temporaries)."""

        def chunk(k, carry):
            acc_loss, acc_pos = carry
            if ncw == 1:
                kr, kc = k, 0
            elif nrc == 1:
                kr, kc = 0, k
            else:
                kr = k // ncw
                kc = k - kr * ncw
            r0 = kr * ch if isinstance(kr, int) else pl.multiple_of(kr * ch, ch)
            c0 = kc * cw if isinstance(kc, int) else pl.multiple_of(kc * cw, cw)

            p = pred_ref[pl.ds(r0, ch), pl.ds(c0, cw)].astype(jnp.float32)
            g = gt_ref[pl.ds(r0, ch), pl.ds(c0, cw)].astype(jnp.float32)

            # Shared-exp sigmoid / log-sigmoid: 1 exp + 1 log1p + 1 divide.
            e = jnp.exp(-jnp.abs(p))                    # exp(-|x|) in (0, 1]
            log1p_e = jnp.log1p(e)
            log_sig_pos = jnp.minimum(p, 0.0) - log1p_e     # log sigmoid(p)
            log_sig_neg = -jnp.maximum(p, 0.0) - log1p_e    # log sigmoid(-p)
            r = 1.0 / (1.0 + e)
            er = e * r
            nonneg = p >= 0.0
            sig = jnp.where(nonneg, r, er)              # sigmoid(p)
            one_m_sig = jnp.where(nonneg, er, r)        # 1 - sigmoid(p)

            is_pos = g >= 1.0
            pos_term = log_sig_pos * one_m_sig * one_m_sig
            neg_term = log_sig_neg * sig * sig * _neg_weights(1.0 - g, gamma)
            loss = jnp.where(is_pos, pos_term, neg_term)    # merged pos+neg
            pos_f = is_pos.astype(jnp.float32)

            if has_weight:
                w = w_ref[pl.ds(r0, ch), :].astype(jnp.float32)  # (ch, 1)
                loss = loss * w                         # single weight mul

            if masked:
                valid = None
                if mask_rows:
                    rid = lax.broadcasted_iota(jnp.int32, (ch, cw), 0) \
                        + (i * tr + r0)
                    valid = rid < true_r
                if mask_cols:
                    cid = lax.broadcasted_iota(jnp.int32, (ch, cw), 1) \
                        + (j * tl + c0)
                    cvalid = cid < true_l
                    valid = cvalid if valid is None else (valid & cvalid)
                # Select after the math: garbage (NaN/Inf) in the ragged tail
                # never reaches the accumulators.
                loss = jnp.where(valid, loss, 0.0)
                pos_f = jnp.where(valid, pos_f, 0.0)

            return acc_loss + loss, acc_pos + pos_f

        zero = jnp.zeros((ch, cw), jnp.float32)
        if nchunks == 1:
            return chunk(0, (zero, zero))
        return lax.fori_loop(0, nchunks, chunk, (zero, zero), unroll=2)

    def flush(acc_loss, acc_pos):
        # One cross-lane reduce per block (amortized over all chunks), written
        # as a lane-dense (8,128) tile: [0,0]=loss_sum, [0,1]=pos_count.
        loss_sum = jnp.sum(acc_loss)
        pos_sum = jnp.sum(acc_pos)
        row = lax.broadcasted_iota(jnp.int32, (8, _LANE), 0)
        lane = lax.broadcasted_iota(jnp.int32, (8, _LANE), 1)
        tile = jnp.where((row == 0) & (lane == 0), loss_sum,
                         jnp.where((row == 0) & (lane == 1), pos_sum, 0.0))
        out_ref[0, 0] = tile

    if not (mask_rows or mask_cols):
        acc_loss, acc_pos = block_sums(False)
        flush(acc_loss, acc_pos)
    else:
        # Ragged-tail masking only on edge blocks; interior blocks run the
        # unmasked body.
        terms = []
        if mask_rows:
            terms.append(i == gi - 1)
        if mask_cols:
            terms.append(j == gj - 1)
        is_edge = terms[0]
        for t in terms[1:]:
            is_edge = jnp.logical_or(is_edge, t)

        @pl.when(is_edge)
        def _():
            al, ap = block_sums(True)
            flush(al, ap)

        @pl.when(jnp.logical_not(is_edge))
        def _():
            al, ap = block_sums(False)
            flush(al, ap)


def focal_logits_loss(pred, gt, gamma=4, weights_list=None):
    """Pallas implementation of FocalLogitsLoss.forward.

    pred, gt: (B, C, H, W) arrays (NCHW, matching the PyTorch module); kept at
    their native dtype in HBM (kernel computes in f32).  Returns scalar f32.
    """
    assert pred.shape == gt.shape and pred.ndim == 4
    B, C, H, W = pred.shape
    R, L = B * C, H * W

    # reshape only (no copy, no dtype cast, no padding of the big arrays)
    pred2 = pred.reshape(R, L)
    gt2 = gt.reshape(R, L)

    itemsizes = (pred.dtype.itemsize, gt.dtype.itemsize)
    sub = max(_sublane_multiple(s) for s in itemsizes)
    budget_itemsize = max(itemsizes)

    TR, TL, CH, CW, vmem_cap = _choose_tiles(R, L, sub, budget_itemsize)
    GI, GJ = pl.cdiv(R, TR), pl.cdiv(L, TL)
    mask_rows = (R % TR) != 0
    mask_cols = (L % TL) != 0

    has_weight = weights_list is not None
    tile_spec = pl.BlockSpec((TR, TL), lambda i, j: (i, j))
    inputs = [pred2, gt2]
    in_specs = [tile_spec, tile_spec]
    if has_weight:
        ch_w = jnp.asarray(weights_list, jnp.float32)
        assert ch_w.shape == (C,)
        row_w = jnp.tile(ch_w, B).reshape(R, 1)      # tiny (R, 1), not (R, L)
        inputs.append(row_w)
        in_specs.append(pl.BlockSpec((TR, 1), lambda i, j: (i, 0)))

    kernel = functools.partial(
        _focal_kernel,
        gamma=gamma, true_r=R, true_l=L, has_weight=has_weight,
        tr=TR, tl=TL, ch=CH, cw=CW, gi=GI, gj=GJ,
        mask_rows=mask_rows, mask_cols=mask_cols)

    # In-flight VMEM = 2 streams x 2 pipeline buffers x block -> <=16 MiB even
    # with the bigger v5e/v6e blocks; limits chosen per physical VMEM size.
    vmem_limit = (64 if vmem_cap >= 100 * 1024 * 1024 else 32) * 1024 * 1024

    partials = pl.pallas_call(
        kernel,
        out_shape=jax.ShapeDtypeStruct((GI, GJ, 8, _LANE), jnp.float32),
        grid_spec=pltpu.PrefetchScalarGridSpec(
            num_scalar_prefetch=0,
            grid=(GI, GJ),
            in_specs=in_specs,
            out_specs=pl.BlockSpec((1, 1, 8, _LANE), lambda i, j: (i, j, 0, 0)),
        ),
        compiler_params=pltpu.CompilerParams(
            dimension_semantics=("parallel", "parallel"),
            vmem_limit_bytes=vmem_limit,
        ),
    )(*inputs)

    loss_sum = jnp.sum(partials[:, :, 0, 0])
    num_pos = jnp.sum(partials[:, :, 0, 1])
    # The positive contribution is exactly 0 when num_pos == 0, so the PyTorch
    # num_pos==0 branch (-neg_loss) coincides with -(pos+neg)/max(num_pos, 1).
    return -loss_sum / jnp.maximum(num_pos, 1.0)


def focal_logits_loss_ref(pred, gt, gamma=4, weights_list=None):
    """Pure-JAX reference mirroring the PyTorch module."""
    pred = pred.astype(jnp.float32)
    gt = gt.astype(jnp.float32)
    pos_inds = (gt >= 1.0).astype(jnp.float32)
    neg_inds = (gt < 1.0).astype(jnp.float32)
    neg_weights = jnp.power(1.0 - gt, float(gamma))
    sig = jax.nn.sigmoid(pred)
    pos_loss = jax.nn.log_sigmoid(pred) * jnp.square(1.0 - sig) * pos_inds
    neg_loss = jax.nn.log_sigmoid(-pred) * jnp.square(sig) * neg_weights * neg_inds
    num_pos = pos_inds.sum()
    if weights_list is None:
        p = pos_loss.sum()
        n = neg_loss.sum()
    else:
        w = jnp.asarray(weights_list, jnp.float32)
        p = jnp.sum(pos_loss.sum(axis=(0, 2, 3)) * w)
        n = jnp.sum(neg_loss.sum(axis=(0, 2, 3)) * w)
    return jnp.where(num_pos > 0, -(p + n) / jnp.maximum(num_pos, 1.0), -n)


if __name__ == "__main__":
    key = jax.random.PRNGKey(0)
    k1, k2 = jax.random.split(key)

    # 1) default module config: gamma=4, no channel weights, tile-aligned shape
    B, C, H, W = 2, 4, 16, 16
    pred = jax.random.normal(k1, (B, C, H, W), jnp.float32)
    u = jax.random.uniform(k2, (B, C, H, W), jnp.float32)
    gt = jnp.where(u > 0.95, 1.0, u * 0.9).astype(jnp.float32)

    loss = jax.block_until_ready(focal_logits_loss(pred, gt, gamma=4))
    ref = jax.block_until_ready(focal_logits_loss_ref(pred, gt, gamma=4))
    np.testing.assert_allclose(np.asarray(loss), np.asarray(ref), rtol=1e-5, atol=1e-5)

    # 2) channel weights + ragged (non-tile-multiple) shapes -> exercises the
    #    (R,1) weight stream and the edge-block masking path.
    k3, k4 = jax.random.split(k2)
    B2, C2, H2, W2 = 2, 3, 10, 30
    pred2 = jax.random.normal(k3, (B2, C2, H2, W2), jnp.float32)
    u2 = jax.random.uniform(k4, (B2, C2, H2, W2), jnp.float32)
    gt2 = jnp.where(u2 > 0.9, 1.0, u2 * 0.8).astype(jnp.float32)
    wl = [0.5, 1.0, 2.0]
    loss2 = jax.block_until_ready(focal_logits_loss(pred2, gt2, gamma=4, weights_list=wl))
    ref2 = jax.block_until_ready(focal_logits_loss_ref(pred2, gt2, gamma=4, weights_list=wl))
    np.testing.assert_allclose(np.asarray(loss2), np.asarray(ref2), rtol=1e-5, atol=1e-5)

    # 3) bf16 inputs -> exercises the dtype-aware (16,128)-packed tiling and
    #    the row-only ragged mask (kernel still accumulates in f32).
    k5, k6 = jax.random.split(k4)
    B3, C3, H3, W3 = 2, 4, 16, 24
    pred3 = jax.random.normal(k5, (B3, C3, H3, W3), jnp.float32).astype(jnp.bfloat16)
    u3 = jax.random.uniform(k6, (B3, C3, H3, W3), jnp.float32)
    gt3 = jnp.where(u3 > 0.93, 1.0, u3 * 0.9).astype(jnp.bfloat16)
    loss3 = jax.block_until_ready(focal_logits_loss(pred3, gt3, gamma=4))
    ref3 = jax.block_until_ready(focal_logits_loss_ref(pred3, gt3, gamma=4))
    np.testing.assert_allclose(np.asarray(loss3), np.asarray(ref3), rtol=1e-5, atol=1e-5)

    print("KERNEL_OK")
</pallas_src>

<mosaic_0001>
module attributes {stable_mosaic.version = 11 : i64} {
  func.func @_focal_kernel(%arg0: i32, %arg1: i32, %arg2: memref<8x256xf32, #tpu.memory_space<vmem>>, %arg3: memref<8x256xf32, #tpu.memory_space<vmem>>, %arg4: memref<1x1x8x128xf32, #tpu.memory_space<vmem>>) attributes {dimension_semantics = [#tpu.dimension_semantics<parallel>, #tpu.dimension_semantics<parallel>], iteration_bounds = array<i64: 1, 1>, scalar_prefetch = 0 : i64, scratch_operands = 0 : i64, tpu.core_type = #tpu.core_type<tc>, window_params = [{transform_indices = @transform_0, window_bounds = array<i64: 8, 256>}, {transform_indices = @transform_1, window_bounds = array<i64: 8, 256>}, {transform_indices = @transform_2, window_bounds = array<i64: 1, 1, 8, 128>}]} {
    %cst = arith.constant 0.000000e+00 : f32
    %0 = vector.broadcast %cst : f32 to vector<8x256xf32>
    %c0 = arith.constant 0 : index
    %c0_0 = arith.constant 0 : index
    %1 = vector.load %arg2[%c0, %c0_0] : memref<8x256xf32, #tpu.memory_space<vmem>>, vector<8x256xf32>
    %c0_1 = arith.constant 0 : index
    %c0_2 = arith.constant 0 : index
    %2 = vector.load %arg3[%c0_1, %c0_2] : memref<8x256xf32, #tpu.memory_space<vmem>>, vector<8x256xf32>
    %3 = math.absf %1 : vector<8x256xf32>
    %cst_3 = arith.constant 0.000000e+00 : f32
    %4 = vector.broadcast %cst_3 : f32 to vector<8x256xf32>
    %5 = arith.subf %4, %3 : vector<8x256xf32>
    %6 = math.exp %5 : vector<8x256xf32>
    %7 = math.log1p %6 : vector<8x256xf32>
    %cst_4 = arith.constant 0.000000e+00 : f32
    %8 = vector.broadcast %cst_4 : f32 to vector<8x256xf32>
    %9 = arith.minimumf %1, %8 : vector<8x256xf32>
    %10 = arith.subf %9, %7 : vector<8x256xf32>
    %cst_5 = arith.constant 0.000000e+00 : f32
    %11 = vector.broadcast %cst_5 : f32 to vector<8x256xf32>
    %12 = arith.maximumf %1, %11 : vector<8x256xf32>
    %cst_6 = arith.constant 0.000000e+00 : f32
    %13 = vector.broadcast %cst_6 : f32 to vector<8x256xf32>
    %14 = arith.subf %13, %12 : vector<8x256xf32>
    %15 = arith.subf %14, %7 : vector<8x256xf32>
    %cst_7 = arith.constant 1.000000e+00 : f32
    %16 = vector.broadcast %cst_7 : f32 to vector<8x256xf32>
    %17 = arith.addf %16, %6 : vector<8x256xf32>
    %cst_8 = arith.constant 1.000000e+00 : f32
    %18 = vector.broadcast %cst_8 : f32 to vector<8x256xf32>
    %19 = arith.divf %18, %17 : vector<8x256xf32>
    %20 = arith.mulf %6, %19 : vector<8x256xf32>
    %cst_9 = arith.constant 0.000000e+00 : f32
    %21 = vector.broadcast %cst_9 : f32 to vector<8x256xf32>
    %22 = arith.cmpf oge, %1, %21 : vector<8x256xf32>
    %23 = arith.select %22, %19, %20 : vector<8x256xi1>, vector<8x256xf32>
    %24 = arith.select %22, %20, %19 : vector<8x256xi1>, vector<8x256xf32>
    %cst_10 = arith.constant 1.000000e+00 : f32
    %25 = vector.broadcast %cst_10 : f32 to vector<8x256xf32>
    %26 = arith.cmpf oge, %2, %25 : vector<8x256xf32>
    %27 = arith.mulf %10, %24 : vector<8x256xf32>
    %28 = arith.mulf %27, %24 : vector<8x256xf32>
    %29 = arith.mulf %15, %23 : vector<8x256xf32>
    %30 = arith.mulf %29, %23 : vector<8x256xf32>
    %cst_11 = arith.constant 1.000000e+00 : f32
    %31 = vector.broadcast %cst_11 : f32 to vector<8x256xf32>
    %32 = arith.subf %31, %2 : vector<8x256xf32>
    %33 = arith.mulf %32, %32 : vector<8x256xf32>
    %34 = arith.mulf %33, %33 : vector<8x256xf32>
    %35 = arith.mulf %30, %34 : vector<8x256xf32>
    %36 = arith.select %26, %28, %35 : vector<8x256xi1>, vector<8x256xf32>
    %37 = arith.extui %26 : vector<8x256xi1> to vector<8x256xi32>
    %38 = arith.sitofp %37 : vector<8x256xi32> to vector<8x256xf32>
    %39 = arith.addf %0, %36 : vector<8x256xf32>
    %40 = arith.addf %0, %38 : vector<8x256xf32>
    %41 = vector.shape_cast %39 : vector<8x256xf32> to vector<1x8x256xf32>
    %cst_12 = arith.constant dense<0.000000e+00> : vector<1xf32>
    %42 = vector.multi_reduction <add>, %41, %cst_12 [1, 2] : vector<1x8x256xf32> to vector<1xf32>
    %43 = vector.shape_cast %42 : vector<1xf32> to vector<1x1x1xf32>
    %44 = vector.extract %43[0, 0, 0] : f32 from vector<1x1x1xf32>
    %45 = vector.shape_cast %40 : vector<8x256xf32> to vector<1x8x256xf32>
    %cst_13 = arith.constant dense<0.000000e+00> : vector<1xf32>
    %46 = vector.multi_reduction <add>, %45, %cst_13 [1, 2] : vector<1x8x256xf32> to vector<1xf32>
    %47 = vector.shape_cast %46 : vector<1xf32> to vector<1x1x1xf32>
    %48 = vector.extract %47[0, 0, 0] : f32 from vector<1x1x1xf32>
    %49 = tpu.iota {dimensions = array<i32: 0>} : vector<8x128xi32>
    %50 = tpu.iota {dimensions = array<i32: 1>} : vector<8x128xi32>
    %c0_i32 = arith.constant 0 : i32
    %51 = vector.broadcast %c0_i32 : i32 to vector<8x128xi32>
    %52 = arith.cmpi eq, %49, %51 : vector<8x128xi32>
    %c0_i32_14 = arith.constant 0 : i32
    %53 = vector.broadcast %c0_i32_14 : i32 to vector<8x128xi32>
    %54 = arith.cmpi eq, %50, %53 : vector<8x128xi32>
    %55 = arith.andi %52, %54 : vector<8x128xi1>
    %c0_i32_15 = arith.constant 0 : i32
    %56 = vector.broadcast %c0_i32_15 : i32 to vector<8x128xi32>
    %57 = arith.cmpi eq, %49, %56 : vector<8x128xi32>
    %c1_i32 = arith.constant 1 : i32
    %58 = vector.broadcast %c1_i32 : i32 to vector<8x128xi32>
    %59 = arith.cmpi eq, %50, %58 : vector<8x128xi32>
    %60 = arith.andi %57, %59 : vector<8x128xi1>
    %cst_16 = arith.constant 0.000000e+00 : f32
    %61 = vector.broadcast %48 : f32 to vector<8x128xf32>
    %62 = vector.broadcast %cst_16 : f32 to vector<8x128xf32>
    %63 = arith.select %60, %61, %62 : vector<8x128xi1>, vector<8x128xf32>
    %64 = vector.broadcast %44 : f32 to vector<8x128xf32>
    %65 = arith.select %55, %64, %63 : vector<8x128xi1>, vector<8x128xf32>
    %c0_17 = arith.constant 0 : index
    %c0_18 = arith.constant 0 : index
    %c0_19 = arith.constant 0 : index
    %c0_20 = arith.constant 0 : index
    %66 = vector.load %arg4[%c0_17, %c0_18, %c0_19, %c0_20] : memref<1x1x8x128xf32, #tpu.memory_space<vmem>>, vector<1x1x8x128xf32>
    %67 = vector.shape_cast %66 : vector<1x1x8x128xf32> to vector<8x128xf32>
    %68 = vector.shape_cast %65 : vector<8x128xf32> to vector<1x1x8x128xf32>
    tpu.vector_store %arg4[%c0_17, %c0_18, %c0_19, %c0_20], %68 {strides = array<i32>} : memref<1x1x8x128xf32, #tpu.memory_space<vmem>>, vector<1x1x8x128xf32>,
    return
  }
  func.func @transform_0(%arg0: i32, %arg1: i32) -> (i32, i32) {
    %c0_i32 = arith.constant 0 : i32
    return %arg0, %arg1 : i32, i32
  }
  func.func @transform_1(%arg0: i32, %arg1: i32) -> (i32, i32) {
    %c0_i32 = arith.constant 0 : i32
    return %arg0, %arg1 : i32, i32
  }
  func.func @transform_2(%arg0: i32, %arg1: i32) -> (i32, i32, i32, i32) {
    %c0_i32 = arith.constant 0 : i32
    %c0_i32_0 = arith.constant 0 : i32
    %c0_i32_1 = arith.constant 0 : i32
    return %arg0, %arg1, %c0_i32, %c0_i32_0 : i32, i32, i32, i32
  }
}

</mosaic_0001>

<bundles_post_ra>
// kernel: tpu_custom_call.1
= control target key start
LH: loop header
LB: loop body
LE: loop exit
PB: predicated region body
PF: predicated region fallthrough
CT: control target
= control target key end

     0   :  { %7 = vsyncpa [#allocation3], 0  ;;  %s284_s0 = inlined_call_operand.hbm [shape: f32[8,256], index: 0, kind: input, shape index: {}]   ;;  %s285_s1 = inlined_call_operand.hbm [shape: f32[8,256], index: 1, kind: input, shape index: {}]   ;;  %s286_s2 = inlined_call_operand.hbm [shape: f32[1,1,8,128], index: 2, kind: output, shape index: {}]  }
   0x1   :  { %8 = vsyncpa [#allocation6], 0 }
   0x2   :  { %9 = vsyncpa [#allocation4], 0  ;;  %s256_s9 = smov [#allocation2]   ;;  %s257_s11 = smov [#allocation5]  }
   0x3   :  { %s16_s10 = sshll.u32 %s256_s9, 4  ;;  %s26_s12 = sshll.u32 %s257_s11, 4  ;;  %s17_s10 = int_to_ptr.vmem [resolvable:$true] %s16_s10  ;;  %s27_s12 = int_to_ptr.vmem [resolvable:$true] %s26_s12 }
   0x4   :  { %s198_s13 = scalar_lea.vmem %s17_s10, 256  ;;  %p203_p1 = scmp.lt.s32.totalorder %s17_s10, %s17_s10 }
   0x5   :  { %p199_p0 = scmp.ne.s32.totalorder %s17_s10, %s198_s13  ;;  %p204_p2 = scmp.lt.s32.totalorder %s198_s13, %s198_s13 }
   0x7   :  { %p205_p3 = por %p204_p2, %p203_p1 }
   0x9   :  { %p206_p4 = pnand %p205_p3, %p199_p0 }
   0xb   :  { %209 = shalt.err (!%p206_p4)
}
   0xc   :  { %19 = dma.hbm_to_vmem [thread:$0]  %s284_s0, 256, %s17_s10, [#allocation3]  }
   0xd   :  { %s218_s16 = scalar_lea.vmem %s27_s12, 256  ;;  %p223_p6 = scmp.lt.s32.totalorder %s27_s12, %s27_s12 }
   0xe   :  { %p219_p5 = scmp.ne.s32.totalorder %s27_s12, %s218_s16  ;;  %p224_p7 = scmp.lt.s32.totalorder %s218_s16, %s218_s16 }
  0x10   :  { %p225_p8 = por %p224_p7, %p223_p6 }
  0x12   :  { %p226_p9 = pnand %p225_p8, %p219_p5 }
  0x14   :  { %229 = shalt.err (!%p226_p9)
}
  0x15   :  { %29 = dma.hbm_to_vmem [thread:$0]  %s285_s1, 256, %s27_s12, [#allocation6]  }
  0x16   :  { %250 = dma.done.wait [#allocation3], 256  }
  0x17   :  { %251 = vsyncadd [#allocation3], 4294967040 }
  0x18   :  { %252 = dma.done.wait [#allocation6], 256  }
  0x19   :  { %253 = vsyncadd [#allocation6], 4294967040  ;;  %v36_v0 = vld [vmem:[#allocation2] sm:$0xff]  ;;  %v37_v1 = vld [vmem:[#allocation2 + $0x8] sm:$0xff]  ;;  %s259_s1 = smov [#allocation7]  }
  0x1a   :  { %v40_v2 = vand.u32 2147483647, %v36_v0  ;;  %v41_v3 = vand.u32 2147483647, %v37_v1  ;;  %v38_v13 = vld [vmem:[#allocation5] sm:$0xff]  ;;  %v39_v17 = vld [vmem:[#allocation5 + $0x8] sm:$0xff] }
  0x1b   :  { %v100_v16 = vsub.f32 1.0, %v38_v13  ;;  %v70_v20 = vmax.f32 %v36_v0, 0.0  ;;  %v71_v22 = vmax.f32 %v37_v1, 0.0  ;;  %v101_v24 = vsub.f32 1.0, %v39_v17  ;;  %s158_s19 = sshll.u32 %s259_s1, 4  ;;  %s159_s19 = int_to_ptr.vmem [resolvable:$true] %s158_s19 }
  0x1c   :  { %v42_v4 = vsub.f32 0.0, %v40_v2  ;;  %v43_v5 = vsub.f32 0.0, %v41_v3  ;;  %v66_v28 = vmin.f32 %v36_v0, 0.0  ;;  %v67_v32 = vmin.f32 %v37_v1, 0.0  ;;  %s230_s21 = scalar_lea.vmem %s159_s19, 128  ;;  %p235_p11 = scmp.lt.s32.totalorder %s159_s19, %s159_s19 }
  0x1d   :  { %v102_v25 = vmul.f32 %v100_v16, %v100_v16  ;;  %v72_v29 = vsub.f32 0.0, %v70_v20  ;;  %v73_v33 = vsub.f32 0.0, %v71_v22  ;;  %vm84_vm2 = vcmp.ge.f32.partialorder %v36_v0, 0.0  ;;  %p231_p10 = scmp.ne.s32.totalorder %s159_s19, %s230_s21  ;;  %p236_p12 = scmp.lt.s32.totalorder %s230_s21, %s230_s21 }
  0x1e   :  { %v44_v6 = vmul.f32 1.442695, %v42_v4  ;;  %v46_v7 = vmul.f32 1.442695, %v43_v5  ;;  %vm85_vm3 = vcmp.ge.f32.partialorder %v37_v1, 0.0  ;;  %v103_v39 = vmul.f32 %v101_v24, %v101_v24 }
  0x1f   :  { %v104_v40 = vmul.f32 %v102_v25, %v102_v25  ;;  %vm90_vm4 = vcmp.ge.f32.partialorder %v38_v13, 1.0  ;;  %vm91_vm5 = vcmp.ge.f32.partialorder %v39_v17, 1.0  ;;  %v258_v0 = vmov 0.0   ;;  %p237_p13 = por %p236_p12, %p235_p11 }
  0x20   :  { %178 = vpow2.f32 %v44_v6  ;;  %v105_v55 = vmul.f32 %v103_v39, %v103_v39  ;;  %v168_v1 = vsel %vm90_vm4, 1.0, %v258_v0  ;;  %v169_v2 = vsel %vm91_vm5, 1.0, %v258_v0 }
  0x21   :  { %180 = vpow2.f32 %v46_v7  ;;  %v128_v4 = vadd.f32 %v169_v2, %v168_v1  ;;  %p238_p0 = pnand %p237_p13, %p231_p10 }
  0x2d   :  { %v179_v8 = vpop.eup %178 }
  0x2e   :  { %v181_v9 = vpop.eup %180  ;;  %v48_v10 = vadd.f32 1.0, %v179_v8  ;;  %v51_v12 = vmul.f32 -0.5, %v179_v8  ;;  %v54_v18 = vand.u32 2147483647, %v179_v8 }
  0x2f   :  { %v57_v11 = vadd.f32 1.0, %v181_v9  ;;  %v60_v14 = vmul.f32 -0.5, %v181_v9  ;;  %v63_v21 = vand.u32 2147483647, %v181_v9 }
  0x30   :  { %182 = vlog2.f32 %v48_v10  ;;  %v52_v15 = vadd.f32 1.0, %v51_v12  ;;  %vm55_vm0 = vcmp.lt.f32.partialorder %v54_v18, 0.0004427343 }
  0x31   :  { %184 = vlog2.f32 %v57_v11  ;;  %v61_v19 = vadd.f32 1.0, %v60_v14  ;;  %vm64_vm1 = vcmp.lt.f32.partialorder %v63_v21, 0.0004427343 }
  0x32   :  { %186 = vrcp.f32 %v48_v10  ;;  %v53_v23 = vmul.f32 %v179_v8, %v52_v15 }
  0x33   :  { %188 = vrcp.f32 %v57_v11  ;;  %v62_v27 = vmul.f32 %v181_v9, %v61_v19  ;;  %v138_v19 = vlaneseq }
  0x35   :  { %v139_v20 = vshrl.u32 %v138_v19, 7  ;;  %v141_v21 = vand.u32 127, %v138_v19 }
  0x37   :  { %vm142_vm6 = vcmp.eq.s32.totalorder %v139_v20, 0  ;;  %vm145_vm7 = vcmp.eq.s32.totalorder %v141_v21, 1  ;;  %vm143_vm8 = vcmp.eq.s32.totalorder %v141_v21, 0 }
  0x38   :  { %vm146_vm9 = vmand %vm142_vm6, %vm145_vm7 }
  0x39   :  { %vm144_vm10 = vmand %vm142_vm6, %vm143_vm8 }
  0x3d   :  { %v183_v26 = vpop.eup %182 }
  0x3e   :  { %v185_v30 = vpop.eup %184  ;;  %v50_v31 = vmul.f32 0.6931472, %v183_v26 }
  0x3f   :  { %v187_v34 = vpop.eup %186  ;;  %v59_v35 = vmul.f32 0.6931472, %v185_v30 }
  0x40   :  { %v189_v36 = vpop.eup %188  ;;  %v56_v37 = vsel %vm55_vm0, %v53_v23, %v50_v31  ;;  %v82_v38 = vmul.f32 %v187_v34, %v179_v8 }
  0x41   :  { %v65_v41 = vsel %vm64_vm1, %v62_v27, %v59_v35  ;;  %v68_v42 = vsub.f32 %v66_v28, %v56_v37  ;;  %v74_v43 = vsub.f32 %v72_v29, %v56_v37  ;;  %v83_v44 = vmul.f32 %v189_v36, %v181_v9 }
  0x42   :  { %v69_v45 = vsub.f32 %v67_v32, %v65_v41  ;;  %v75_v46 = vsub.f32 %v73_v33, %v65_v41  ;;  %v86_v47 = vsel %vm84_vm2, %v187_v34, %v82_v38  ;;  %v88_v48 = vsel %vm84_vm2, %v82_v38, %v187_v34 }
  0x43   :  { %v87_v49 = vsel %vm85_vm3, %v189_v36, %v83_v44  ;;  %v89_v50 = vsel %vm85_vm3, %v83_v44, %v189_v36  ;;  %v92_v51 = vmul.f32 %v88_v48, %v68_v42  ;;  %v96_v52 = vmul.f32 %v86_v47, %v74_v43 }
  0x44   :  { %v93_v53 = vmul.f32 %v89_v50, %v69_v45  ;;  %v97_v54 = vmul.f32 %v87_v49, %v75_v46 }
  0x45   :  { %v94_v56 = vmul.f32 %v92_v51, %v88_v48  ;;  %v98_v57 = vmul.f32 %v96_v52, %v86_v47 }
  0x46   :  { %v95_v58 = vmul.f32 %v93_v53, %v89_v50  ;;  %v99_v59 = vmul.f32 %v97_v54, %v87_v49 }
  0x47   :  { %v106_v60 = vmul.f32 %v104_v40, %v98_v57 }
  0x48   :  { %v107_v61 = vmul.f32 %v105_v55, %v99_v59 }
  0x49   :  { %v108_v62 = vsel %vm90_vm4, %v94_v56, %v106_v60 }
  0x4a   :  { %v109_v63 = vsel %vm91_vm5, %v95_v58, %v107_v61 }
  0x4b   :  { %v118_v3 = vadd.f32 %v109_v63, %v108_v62 }
  0x4d   :  { %119 = vadd.xlane.f32.xlu0 %v118_v3 }
  0x51   :  { %129 = vadd.xlane.f32.xlu0 %v128_v4 }
  0xd6   :  { %v120_v5 = vpop.xlane.xlu0 %119 }
  0xd7   :  { %v121_v6 = vrot.slane %v120_v5, 4 }
  0xd9   :  { %v122_v7 = vadd.f32 %v121_v6, %v120_v5 }
  0xda   :  { %v130_v8 = vpop.xlane.xlu0 %129 }
  0xdb   :  { %v123_v9 = vrot.slane %v122_v7, 2  ;;  %v131_v10 = vrot.slane %v130_v8, 4 }
  0xdd   :  { %v132_v11 = vadd.f32 %v131_v10, %v130_v8  ;;  %v124_v12 = vadd.f32 %v123_v9, %v122_v7 }
  0xdf   :  { %v133_v13 = vrot.slane %v132_v11, 2  ;;  %v125_v14 = vrot.slane %v124_v12, 1 }
  0xe1   :  { %v134_v15 = vadd.f32 %v133_v13, %v132_v11  ;;  %v126_v16 = vadd.f32 %v125_v14, %v124_v12 }
  0xe3   :  { %170 = vpush %v126_v16  ;;  %v135_v17 = vrot.slane %v134_v15, 1 }
  0xe5   :  { %v136_v18 = vadd.f32 %v135_v17, %v134_v15 }
  0xe7   :  { %172 = vpush %v136_v18 }
 0x114   :  { %s171_s0 = spop %170 }
 0x115   :  { %v149_v23 = vstv %s171_s0 }
 0x118   :  { %s173_s20 = spop %172 }
 0x119   :  { %v147_v22 = vstv %s173_s20 }
 0x11a   :  { %v148_v24 = vsel %vm146_vm9, %v147_v22, 0.0 }
 0x11b   :  { %v150_v25 = vsel %vm144_vm10, %v149_v23, %v148_v24 }
 0x11c   :  { %151 = vst [vmem:[#allocation7] sm:$0xff] %v150_v25 }
 0x11d   :  { %241 = shalt.err (!%p238_p0)
}
 0x11e   :  { %161 = dma.vmem_to_hbm [thread:$0]  %s159_s19, 128, %s286_s2, [#allocation4]  }
 0x11f   :  { %254 = dma.done.wait [#allocation4], 128  }
 0x120   :  { %255 = vsyncadd [#allocation4], 4294967168 }
 0x121   :  { %165 = vsyncpa [#allocation3], 1 }
 0x122   :  { %166 = vsyncpa [#allocation6], 1 }
 0x123   :  { %167 = vsyncpa [#allocation4], 1 }

</bundles_post_ra>
